<compile_context>
chip_gen: v6e
topology: v6e:2x2x1
jax: 0.10.0
libtpu: 0.0.40
codegen_flags: <defaults>
</compile_context>

<pallas_src>
import jax
import jax.numpy as jnp
from jax.experimental import pallas as pl
from jax.experimental.pallas import tpu as pltpu

IN_FEATURES = 128
OUT_FEATURES = 2

# Default row-tile: multiple of 8; 512 rows * 128 feats * 4 B = 256 KiB per
# input buffer (x2 for double buffering) -> comfortably inside the scoped
# VMEM limit on v5e (16 MiB), v6e (32 MiB) and v7x (32 MiB default / 64 MiB).
DEFAULT_TILE_ROWS = 512


def _linear_kernel(x_ref, w_ref, b_ref, o_ref):
    # x_ref: (TB, 128)  w_ref: (128, 2)  b_ref: (1, 2)  o_ref: (TB, 2)
    x = x_ref[...]
    w = w_ref[...]
    b = b_ref[...]
    acc = jnp.dot(x, w, preferred_element_type=jnp.float32)
    o_ref[...] = (acc + b).astype(o_ref.dtype)


def fused_linear_pallas(x, w_t, b, tile_rows=DEFAULT_TILE_ROWS):
    """y = x @ w_t + b for a (N, 128) slab, batch-tiled single pallas_call.

    x:   (N, 128) float32
    w_t: (128, 2) float32  (transposed nn.Linear weight)
    b:   (1, 2)   float32
    Returns (N, 2) float32.
    """
    n = x.shape[0]

    # Pick a tile size: multiple of 8, no bigger than the (row-padded) input.
    tb = min(tile_rows, ((n + 7) // 8) * 8)
    tb = max(tb, 8)

    # Pad the batch so it divides evenly into tiles (sliced off at the end).
    n_padded = ((n + tb - 1) // tb) * tb
    if n_padded != n:
        x = jnp.pad(x, ((0, n_padded - n), (0, 0)))

    grid = (n_padded // tb,)

    out = pl.pallas_call(
        _linear_kernel,
        out_shape=jax.ShapeDtypeStruct((n_padded, OUT_FEATURES), x.dtype),
        grid=grid,
        in_specs=[
            # x: one row-tile per grid step (double-buffered by the pipeline).
            pl.BlockSpec((tb, IN_FEATURES), lambda i: (i, 0)),
            # weight / bias: same block every step -> stay resident in VMEM.
            pl.BlockSpec((IN_FEATURES, OUT_FEATURES), lambda i: (0, 0)),
            pl.BlockSpec((1, OUT_FEATURES), lambda i: (0, 0)),
        ],
        out_specs=pl.BlockSpec((tb, OUT_FEATURES), lambda i: (i, 0)),
        compiler_params=pltpu.CompilerParams(
            # Independent row-tiles: shard across TensorCores on v7x.
            dimension_semantics=("parallel",)
        ),
    )(x, w_t, b)

    return out[:n]


class DisPallas:
    """JAX/Pallas equivalent of the PyTorch `Dis` module."""

    def __init__(self, key):
        kw, kb = jax.random.split(key)
        # Deterministic init mirroring nn.Linear default:
        # U(-1/sqrt(128), 1/sqrt(128))
        bound = 1.0 / jnp.sqrt(jnp.float32(IN_FEATURES))
        w = jax.random.uniform(
            kw, (OUT_FEATURES, IN_FEATURES), jnp.float32, -bound, bound
        )
        b = jax.random.uniform(kb, (OUT_FEATURES,), jnp.float32, -bound, bound)
        # Store transposed weight for x @ w_t, bias as (1, 2) for broadcasting.
        self.w_t = jnp.asarray(w.T)          # (128, 2)
        self.b = jnp.asarray(b)[None, :]     # (1, 2)

    def __call__(self, in1, in2, in3):
        # Fuse the three linear applications into ONE pallas_call by stacking
        # the inputs along the batch axis; split the outputs afterwards.
        n1, n2, n3 = in1.shape[0], in2.shape[0], in3.shape[0]
        x = jnp.concatenate([in1, in2, in3], axis=0)        # (n1+n2+n3, 128)
        y = fused_linear_pallas(x, self.w_t, self.b)        # (n1+n2+n3, 2)
        out1 = y[:n1]
        out2 = y[n1:n1 + n2]
        out3 = y[n1 + n2:n1 + n2 + n3]
        return out1, out2, out3


if __name__ == "__main__":
    key = jax.random.PRNGKey(0)
    k_params, k1, k2, k3 = jax.random.split(key, 4)

    model = DisPallas(k_params)

    B = 8  # small batch
    in1 = jax.random.normal(k1, (B, IN_FEATURES), jnp.float32)
    in2 = jax.random.normal(k2, (B, IN_FEATURES), jnp.float32)
    in3 = jax.random.normal(k3, (B, IN_FEATURES), jnp.float32)

    out1, out2, out3 = model(in1, in2, in3)
    jax.block_until_ready((out1, out2, out3))

    # Cross-check against plain-JAX reference.
    ref1 = in1 @ model.w_t + model.b
    ref2 = in2 @ model.w_t + model.b
    ref3 = in3 @ model.w_t + model.b
    assert out1.shape == (B, OUT_FEATURES)
    assert out2.shape == (B, OUT_FEATURES)
    assert out3.shape == (B, OUT_FEATURES)
    assert jnp.allclose(out1, ref1, atol=1e-5), "out1 mismatch"
    assert jnp.allclose(out2, ref2, atol=1e-5), "out2 mismatch"
    assert jnp.allclose(out3, ref3, atol=1e-5), "out3 mismatch"

    print("KERNEL_OK")
</pallas_src>

<mosaic_0001>
module attributes {stable_mosaic.version = 11 : i64} {
  func.func @_linear_kernel(%arg0: i32, %arg1: memref<24x128xf32, #tpu.memory_space<vmem>>, %arg2: memref<128x2xf32, #tpu.memory_space<vmem>>, %arg3: memref<1x2xf32, #tpu.memory_space<vmem>>, %arg4: memref<24x2xf32, #tpu.memory_space<vmem>>) attributes {dimension_semantics = [#tpu.dimension_semantics<parallel>], iteration_bounds = array<i64: 1>, scalar_prefetch = 0 : i64, scratch_operands = 0 : i64, tpu.core_type = #tpu.core_type<tc>, window_params = [{transform_indices = @transform_0, window_bounds = array<i64: 24, 128>}, {pipeline_mode = #tpu.pipeline_mode<synchronous>, transform_indices = @transform_1, window_bounds = array<i64: 128, 2>}, {pipeline_mode = #tpu.pipeline_mode<synchronous>, transform_indices = @transform_2, window_bounds = array<i64: 1, 2>}, {transform_indices = @transform_3, window_bounds = array<i64: 24, 2>}]} {
    %c0 = arith.constant 0 : index
    %c0_0 = arith.constant 0 : index
    %0 = vector.load %arg1[%c0, %c0_0] : memref<24x128xf32, #tpu.memory_space<vmem>>, vector<24x128xf32>
    %c0_1 = arith.constant 0 : index
    %c0_2 = arith.constant 0 : index
    %1 = vector.load %arg2[%c0_1, %c0_2] : memref<128x2xf32, #tpu.memory_space<vmem>>, vector<128x2xf32>
    %c0_3 = arith.constant 0 : index
    %c0_4 = arith.constant 0 : index
    %2 = vector.load %arg3[%c0_3, %c0_4] : memref<1x2xf32, #tpu.memory_space<vmem>>, vector<1x2xf32>
    %cst = arith.constant dense<0.000000e+00> : vector<24x2xf32>
    %3 = tpu.matmul %0, %1, %cst {dimension_numbers = #tpu.dot_dimension_numbers<[1], [0], [0], [1], [0, 0, 1, 1], [], []>} : vector<24x128xf32>, vector<128x2xf32>, vector<24x2xf32> -> vector<24x2xf32>
    %4 = vector.broadcast %2 : vector<1x2xf32> to vector<24x2xf32>
    %5 = arith.addf %3, %4 : vector<24x2xf32>
    %c0_5 = arith.constant 0 : index
    %c0_6 = arith.constant 0 : index
    %6 = vector.load %arg4[%c0_5, %c0_6] : memref<24x2xf32, #tpu.memory_space<vmem>>, vector<24x2xf32>
    tpu.vector_store %arg4[%c0_5, %c0_6], %5 {strides = array<i32>} : memref<24x2xf32, #tpu.memory_space<vmem>>, vector<24x2xf32>,
    return
  }
  func.func @transform_0(%arg0: i32) -> (i32, i32) {
    %c0_i32 = arith.constant 0 : i32
    %c0_i32_0 = arith.constant 0 : i32
    return %arg0, %c0_i32 : i32, i32
  }
  func.func @transform_1(%arg0: i32) -> (i32, i32) {
    %c0_i32 = arith.constant 0 : i32
    %c0_i32_0 = arith.constant 0 : i32
    %c0_i32_1 = arith.constant 0 : i32
    return %c0_i32, %c0_i32_0 : i32, i32
  }
  func.func @transform_2(%arg0: i32) -> (i32, i32) {
    %c0_i32 = arith.constant 0 : i32
    %c0_i32_0 = arith.constant 0 : i32
    %c0_i32_1 = arith.constant 0 : i32
    return %c0_i32, %c0_i32_0 : i32, i32
  }
  func.func @transform_3(%arg0: i32) -> (i32, i32) {
    %c0_i32 = arith.constant 0 : i32
    %c0_i32_0 = arith.constant 0 : i32
    return %arg0, %c0_i32 : i32, i32
  }
}

</mosaic_0001>

<bundles_post_ra>
// kernel: tpu_custom_call.1
= control target key start
LH: loop header
LB: loop body
LE: loop exit
PB: predicated region body
PF: predicated region fallthrough
CT: control target
= control target key end

     0   :  { %v223_v0 = vmov 0.0   ;;  %vm224_vm0 = vmmov 0   ;;  %vm120_vm1 = vcmask 15360   ;;  %s349_s1 = inlined_call_operand.vmem [shape: f32[128,2], index: 1, kind: input, shape index: {}]   ;;  %s350_s0 = inlined_call_operand.vmem [shape: f32[24,128], index: 0, kind: input, shape index: {}]   ;;  %s351_s2 = inlined_call_operand.vmem [shape: f32[1,2], index: 2, kind: input, shape index: {}]   ;;  %s352_s3 = inlined_call_operand.vmem [shape: f32[24,2], index: 3, kind: output, shape index: {}]  }
   0x1   :  { %189 = vmatprep.subr.mxu1 %v223_v0  ;;  %v32_v1 = vld [vmem:[%s349_s1 + $0x78] sm:$0xff]  ;;  %148 = vmatprep.subr.mxu0 %v223_v0  ;;  %v31_v2 = vld [vmem:[%s349_s1 + $0x70] sm:$0xff]  ;;  %v30_v3 = vld [vmem:[%s349_s1 + $0x68] sm:$0xff] }
   0x2   :  { %205 = vmatpush3.msra.mxu1 %v32_v1  ;;  %149 = vmatpush3.msra.mxu0 %v32_v1  ;;  %v29_v4 = vld [vmem:[%s349_s1 + $0x60] sm:$0xff]  ;;  %v28_v5 = vld [vmem:[%s349_s1 + $0x58] sm:$0xff]  ;;  %v27_v6 = vld [vmem:[%s349_s1 + $0x50] sm:$0xff] }
   0x3   :  { %190 = vmatprep.subr.mxu1 %v223_v0  ;;  %150 = vmatprep.subr.mxu0 %v223_v0  ;;  %v26_v7 = vld [vmem:[%s349_s1 + $0x48] sm:$0xff]  ;;  %v25_v8 = vld [vmem:[%s349_s1 + $0x40] sm:$0xff]  ;;  %v24_v9 = vld [vmem:[%s349_s1 + $0x38] sm:$0xff] }
   0x4   :  { %206 = vmatpush3.msra.mxu1 %v31_v2  ;;  %151 = vmatpush3.msra.mxu0 %v31_v2  ;;  %v23_v10 = vld [vmem:[%s349_s1 + $0x30] sm:$0xff]  ;;  %v22_v11 = vld [vmem:[%s349_s1 + $0x28] sm:$0xff]  ;;  %v21_v12 = vld [vmem:[%s349_s1 + $0x20] sm:$0xff] }
   0x5   :  { %191 = vmatprep.subr.mxu1 %v223_v0  ;;  %152 = vmatprep.subr.mxu0 %v223_v0  ;;  %v20_v13 = vld [vmem:[%s349_s1 + $0x18] sm:$0xff]  ;;  %v19_v14 = vld [vmem:[%s349_s1 + $0x10] sm:$0xff]  ;;  %v18_v15 = vld [vmem:[%s349_s1 + $0x8] sm:$0xff] }
   0x6   :  { %207 = vmatpush3.msra.mxu1 %v30_v3  ;;  %153 = vmatpush3.msra.mxu0 %v30_v3  ;;  %v17_v16 = vld [vmem:[%s349_s1] sm:$0xff]  ;;  %v15_v17 = vld [vmem:[%s350_s0 + $0x8] sm:$0xff]  ;;  %v16_v19 = vld [vmem:[%s350_s0 + $0x10] sm:$0xff] }
   0x7   :  { %192 = vmatprep.subr.mxu1 %v223_v0  ;;  %154 = vmatprep.subr.mxu0 %v223_v0  ;;  %v14_v18 = vld [vmem:[%s350_s0] sm:$0xff] }
   0x8   :  { %208 = vmatpush3.msra.mxu1 %v29_v4  ;;  %155 = vmatpush3.msra.mxu0 %v29_v4  ;;  %v128_v20 = vld [vmem:[%s351_s2] ss:$0 sm:$0xff] }
   0x9   :  { %193 = vmatprep.subr.mxu1 %v223_v0  ;;  %156 = vmatprep.subr.mxu0 %v223_v0 }
   0xa   :  { %209 = vmatpush3.msra.mxu1 %v28_v5  ;;  %157 = vmatpush3.msra.mxu0 %v28_v5 }
   0xb   :  { %194 = vmatprep.subr.mxu1 %v223_v0  ;;  %158 = vmatprep.subr.mxu0 %v223_v0 }
   0xc   :  { %210 = vmatpush3.msra.mxu1 %v27_v6  ;;  %159 = vmatpush3.msra.mxu0 %v27_v6 }
   0xd   :  { %195 = vmatprep.subr.mxu1 %v223_v0  ;;  %160 = vmatprep.subr.mxu0 %v223_v0 }
   0xe   :  { %211 = vmatpush3.msra.mxu1 %v26_v7  ;;  %161 = vmatpush3.msra.mxu0 %v26_v7 }
   0xf   :  { %196 = vmatprep.subr.mxu1 %v223_v0  ;;  %162 = vmatprep.subr.mxu0 %v223_v0 }
  0x10   :  { %212 = vmatpush3.msra.mxu1 %v25_v8  ;;  %163 = vmatpush3.msra.mxu0 %v25_v8 }
  0x11   :  { %197 = vmatprep.subr.mxu1 %v223_v0  ;;  %164 = vmatprep.subr.mxu0 %v223_v0 }
  0x12   :  { %213 = vmatpush3.msra.mxu1 %v24_v9  ;;  %165 = vmatpush3.msra.mxu0 %v24_v9 }
  0x13   :  { %198 = vmatprep.subr.mxu1 %v223_v0  ;;  %166 = vmatprep.subr.mxu0 %v223_v0 }
  0x14   :  { %214 = vmatpush3.msra.mxu1 %v23_v10  ;;  %167 = vmatpush3.msra.mxu0 %v23_v10 }
  0x15   :  { %199 = vmatprep.subr.mxu1 %v223_v0  ;;  %168 = vmatprep.subr.mxu0 %v223_v0 }
  0x16   :  { %215 = vmatpush3.msra.mxu1 %v22_v11  ;;  %169 = vmatpush3.msra.mxu0 %v22_v11 }
  0x17   :  { %200 = vmatprep.subr.mxu1 %v223_v0  ;;  %170 = vmatprep.subr.mxu0 %v223_v0 }
  0x18   :  { %216 = vmatpush3.msra.mxu1 %v21_v12  ;;  %171 = vmatpush3.msra.mxu0 %v21_v12 }
  0x19   :  { %201 = vmatprep.subr.mxu1 %v223_v0  ;;  %172 = vmatprep.subr.mxu0 %v223_v0 }
  0x1a   :  { %217 = vmatpush3.msra.mxu1 %v20_v13  ;;  %173 = vmatpush3.msra.mxu0 %v20_v13 }
  0x1b   :  { %202 = vmatprep.subr.mxu1 %v223_v0  ;;  %174 = vmatprep.subr.mxu0 %v223_v0 }
  0x1c   :  { %218 = vmatpush3.msra.mxu1 %v19_v14  ;;  %175 = vmatpush3.msra.mxu0 %v19_v14 }
  0x1d   :  { %203 = vmatprep.subr.mxu1 %v223_v0  ;;  %176 = vmatprep.subr.mxu0 %v223_v0 }
  0x1e   :  { %219 = vmatpush3.msra.mxu1 %v18_v15  ;;  %177 = vmatpush3.msra.mxu0 %v18_v15 }
  0x1f   :  { %204 = vmatprep.subr.mxu1 %v223_v0  ;;  %183 = vmatprep.mubr.msk.f32.mxu1 %vm224_vm0, %v223_v0 }
  0x20   :  { %220 = vmatpush3.msra.mxu1 %v17_v16  ;;  %178 = vmatprep.subr.mxu0 %v223_v0 }
  0x21   :  { %184 = vmatmul.mubr.f32.vlgmr.msra.gmra.mxu1 %v15_v17  ;;  %179 = vmatpush3.msra.mxu0 %v17_v16 }
  0x22   :  { %180 = vmatprep.mubr.msk.f32.mxu0 %vm224_vm0, %v223_v0  ;;  %186 = vmatprep.mubr.msk.f32.mxu1 %vm224_vm0, %v223_v0 }
  0x23   :  { %181 = vmatmul.mubr.f32.vlgmr.msra.gmra.mxu0 %v14_v18 }
  0x25   :  { %187 = vmatmul.mubr.f32.gmra.mxu1 %v16_v19 }
  0xe1   :  { %v111_v21 = vpop.f32.mrf.mxu1 }
  0xe2   :  { %v112_v22 = vadd.f32 %v128_v20, %v111_v21 }
  0xe3   :  { %v106_v23 = vpop.f32.mrf.mxu0  ;;  %v185_v24 = vpop.f32.mrf.mxu1 }
  0xe4   :  { %122 = vst.msk [vmem:[%s352_s3 + $0x8] sm:$0xff] %vm120_vm1, %v112_v22  ;;  %v107_v25 = vadd.f32 %v128_v20, %v106_v23 }
  0xe5   :  { %v182_v26 = vpop.f32.mrf.mxu0  ;;  %v116_v27 = vpop.f32.mrf.mxu1 }
  0xe6   :  { %121 = vst.msk [vmem:[%s352_s3] sm:$0xff] %vm120_vm1, %v107_v25  ;;  %v117_v28 = vadd.f32 %v128_v20, %v116_v27 }
  0xe7   :  { %v188_v29 = vpop.f32.mrf.mxu1 }
  0xe8   :  { %123 = vst.msk [vmem:[%s352_s3 + $0x10] sm:$0xff] %vm120_vm1, %v117_v28 }

</bundles_post_ra>
